<compile_context>
chip_gen: v7x
topology: tpu7x:2x2x1
jax: 0.10.0
libtpu: 0.0.40
codegen_flags: <defaults>
</compile_context>

<pallas_src>
import jax
import jax.numpy as jnp
from jax.experimental import pallas as pl
from jax.experimental.pallas import tpu as pltpu

N_EMBD = 32
N_HEAD = 4
HEAD_SIZE = N_EMBD // N_HEAD
SEQ = 8
BATCH = 2
EPS = 1e-5          # PyTorch nn.LayerNorm default
NEG_BIG = -1e30     # finite "masked" bias (avoids -inf - -inf = NaN)


def _layer_norm(v, g, b):
    mu = jnp.mean(v, axis=-1, keepdims=True)
    var = jnp.mean((v - mu) ** 2, axis=-1, keepdims=True)
    return (v - mu) * jax.lax.rsqrt(var + EPS) * g + b


def block_kernel(x_ref, bias_ref, wqkv_ref, wproj_ref, w1_ref, w2_ref, vecs_ref, o_ref):
    x = x_ref[...]                      # (N, C)  flattened rows of both batch elements
    N, C = x.shape
    H, hs = N_HEAD, HEAD_SIZE

    # Statically sliced views of the packed vector-parameter slab (one DMA for all of them).
    ln1g = vecs_ref[0:1, :C]            # (1, C)
    ln1b = vecs_ref[1:2, :C]
    ln2g = vecs_ref[2:3, :C]
    ln2b = vecs_ref[3:4, :C]
    bproj = vecs_ref[4:5, :C]
    b2 = vecs_ref[5:6, :C]
    b1 = vecs_ref[6:7, :]               # (1, 4C)

    # --- ln1 + multi-head causal self-attention (all heads, all rows in one pass) ---
    xn = _layer_norm(x, ln1g, ln1b)

    # Head-batched fused QKV: weights are host-prepped as (3H, C, hs) with the C**-0.5 score
    # scale already folded into the Q slices.  One leading-batch-dim matmul, no activation
    # slicing/stacking in-kernel.
    xn_b = jnp.broadcast_to(xn[None], (3 * H, N, C))                      # hoisted broadcast
    qkvh = jnp.einsum('gnc,gcd->gnd', xn_b, wqkv_ref[...],
                      preferred_element_type=jnp.float32)                 # (3H, N, hs)
    qh = qkvh[:H]                       # (H, N, hs)  -- leading-axis slices, no lane relayout
    kh = qkvh[H:2 * H]
    vh = qkvh[2 * H:]

    s = jnp.einsum('hqd,hkd->hqk', qh, kh,
                   preferred_element_type=jnp.float32)                    # (H, N, N)
    s = s + bias_ref[...]               # causal + user key mask + cross-batch block mask

    smax = jnp.max(s, axis=-1, keepdims=True)
    e = jnp.exp(s - smax)
    denom = jnp.sum(e, axis=-1, keepdims=True)
    r = pl.reciprocal(denom, approx=True)        # EUP slot
    r = r * (2.0 - denom * r)                    # one Newton step -> full f32 precision
    p = e * r

    oh = jnp.einsum('hqk,hkd->hqd', p, vh,
                    preferred_element_type=jnp.float32)                   # (H, N, hs)

    # Head merge folded into the output projection (host-reshaped to (H, hs, C)); the sum over
    # heads is a cheap add over the leading (major) axis -- no lane concat.
    sah = jnp.einsum('hnd,hdc->hnc', oh, wproj_ref[...],
                     preferred_element_type=jnp.float32)                  # (H, N, C)
    x1 = x + jnp.sum(sah, axis=0) + bproj

    # --- ln2 + feed-forward (Linear -> ReLU -> Linear) ---
    xn2 = _layer_norm(x1, ln2g, ln2b)
    h1 = jnp.maximum(
        jnp.dot(xn2, w1_ref[...], preferred_element_type=jnp.float32) + b1, 0.0)
    h2 = jnp.dot(h1, w2_ref[...], preferred_element_type=jnp.float32) + b2
    o_ref[...] = x1 + h2


def transformer_block(x, mask, params):
    (ln1g, ln1b, wq, wk, wv, wproj, bproj, ln2g, ln2b, w1, b1, w2, b2) = params
    B, T, C = x.shape
    N = B * T
    H, hs = N_HEAD, HEAD_SIZE

    # --- host-side prep (free relative to the kernel launch) ---
    # 1) fused, head-structured QKV weight (3H, C, hs); score scale folded into Q.
    scale = C ** -0.5
    wq_h = (wq.T * scale).reshape(C, H, hs).transpose(1, 0, 2)    # (H, C, hs)
    wk_h = wk.T.reshape(C, H, hs).transpose(1, 0, 2)
    wv_h = wv.T.reshape(C, H, hs).transpose(1, 0, 2)
    wqkv_h = jnp.concatenate([wq_h, wk_h, wv_h], axis=0)          # (3H, C, hs)

    # 2) head-structured output projection (H, hs, C) and plain (in, out) FFN weights.
    wproj_h = wproj.T.reshape(H, hs, C)
    w1_t = w1.T                                                   # (C, 4C)
    w2_t = w2.T                                                   # (4C, C)

    # 3) pack all small vector parameters into one (8, 4C) f32 slab (single DMA).
    vecs = jnp.zeros((8, 4 * C), jnp.float32)
    vecs = vecs.at[0, :C].set(ln1g[0])
    vecs = vecs.at[1, :C].set(ln1b[0])
    vecs = vecs.at[2, :C].set(ln2g[0])
    vecs = vecs.at[3, :C].set(ln2b[0])
    vecs = vecs.at[4, :C].set(bproj[0])
    vecs = vecs.at[5, :C].set(b2[0])
    vecs = vecs.at[6, :].set(b1[0])

    # 4) fused additive attention bias over the flattened (B*T) row axis.
    #    allowed[r, c] = same-batch & causal & user-mask  ->  bias 0, else -1e30.
    bids = jnp.repeat(jnp.arange(B), T)            # batch id of each flattened row
    tids = jnp.tile(jnp.arange(T), B)              # position within sequence
    same_batch = bids[:, None] == bids[None, :]
    causal = tids[:, None] >= tids[None, :]
    key_ok = mask[bids[:, None], tids[:, None], tids[None, :]] != 0
    bias = jnp.where(same_batch & causal & key_ok, 0.0, NEG_BIG).astype(jnp.float32)

    x2d = x.reshape(N, C)
    kernel_args = (x2d, bias, wqkv_h, wproj_h, w1_t, w2_t, vecs)

    out = pl.pallas_call(
        block_kernel,
        out_shape=jax.ShapeDtypeStruct((N, C), jnp.float32),
        in_specs=[pl.BlockSpec(memory_space=pltpu.MemorySpace.VMEM)
                  for _ in range(len(kernel_args))],
        out_specs=pl.BlockSpec(memory_space=pltpu.MemorySpace.VMEM),
    )(*kernel_args)
    return out.reshape(B, T, C)


def ref_block(x, mask, params):
    """Pure-JAX reference mirroring the PyTorch Block.forward semantics (eval mode)."""
    (ln1g, ln1b, wq, wk, wv, wproj, bproj, ln2g, ln2b, w1, b1, w2, b2) = params
    B, T, C = x.shape
    H, hs = N_HEAD, HEAD_SIZE
    xn = _layer_norm(x, ln1g[0], ln1b[0])
    q = xn @ wq.T
    k = xn @ wk.T
    v = xn @ wv.T
    qh = q.reshape(B, T, H, hs).transpose(0, 2, 1, 3)
    kh = k.reshape(B, T, H, hs).transpose(0, 2, 1, 3)
    vh = v.reshape(B, T, H, hs).transpose(0, 2, 1, 3)
    s = jnp.einsum('bhtd,bhsd->bhts', qh, kh) * (C ** -0.5)
    causal = jnp.tril(jnp.ones((T, T), bool))
    allowed = causal[None, None] & (mask[:, None] != 0)
    s = jnp.where(allowed, s, -jnp.inf)
    p = jax.nn.softmax(s, axis=-1)
    attn = jnp.einsum('bhts,bhsd->bhtd', p, vh).transpose(0, 2, 1, 3).reshape(B, T, C)
    x1 = x + attn @ wproj.T + bproj[0]
    xn2 = _layer_norm(x1, ln2g[0], ln2b[0])
    hid = jnp.maximum(xn2 @ w1.T + b1[0], 0.0)
    return x1 + hid @ w2.T + b2[0]


if __name__ == "__main__":
    key = jax.random.PRNGKey(0)
    keys = jax.random.split(key, 8)
    C = N_EMBD

    # Deterministic parameter init (matching PyTorch init *scales*, not values).
    xav = (2.0 / (C + C)) ** 0.5               # xavier_normal std for (C, C)
    ln1g = jnp.ones((1, C), jnp.float32)
    ln1b = jnp.zeros((1, C), jnp.float32)
    ln2g = jnp.ones((1, C), jnp.float32)
    ln2b = jnp.zeros((1, C), jnp.float32)
    wq = jax.random.normal(keys[0], (C, C), jnp.float32) * xav
    wk = jax.random.normal(keys[1], (C, C), jnp.float32) * xav
    wv = jax.random.normal(keys[2], (C, C), jnp.float32) * xav
    wproj = jax.random.normal(keys[3], (C, C), jnp.float32) * xav
    bproj = jnp.zeros((1, C), jnp.float32)
    w1 = jax.random.normal(keys[4], (4 * C, C), jnp.float32) * (2.0 / C) ** 0.5        # kaiming
    b1 = jnp.zeros((1, 4 * C), jnp.float32)
    w2 = jax.random.normal(keys[5], (C, 4 * C), jnp.float32) * (2.0 / (4 * C)) ** 0.5  # kaiming
    b2 = jnp.zeros((1, C), jnp.float32)
    params = (ln1g, ln1b, wq, wk, wv, wproj, bproj, ln2g, ln2b, w1, b1, w2, b2)

    # Inputs: x (B, T, C); attention mask (B, T, T) with some padded key positions in batch 1.
    x = jax.random.normal(keys[6], (BATCH, SEQ, C), jnp.float32)
    valid_len = jnp.array([SEQ, SEQ - 2])
    key_mask = (jnp.arange(SEQ)[None, :] < valid_len[:, None]).astype(jnp.float32)   # (B, T)
    mask = jnp.broadcast_to(key_mask[:, None, :], (BATCH, SEQ, SEQ)).astype(jnp.float32)

    out = transformer_block(x, mask, params)
    jax.block_until_ready(out)

    ref = ref_block(x, mask, params)
    assert out.shape == (BATCH, SEQ, C)
    assert bool(jnp.allclose(out, ref, atol=1e-3, rtol=1e-3)), float(jnp.max(jnp.abs(out - ref)))
    print("KERNEL_OK")
</pallas_src>

<mosaic_0001>
module attributes {stable_mosaic.version = 11 : i64} {
  func.func @block_kernel(%arg0: memref<16x32xf32, #tpu.memory_space<vmem>>, %arg1: memref<16x16xf32, #tpu.memory_space<vmem>>, %arg2: memref<12x32x8xf32, #tpu.memory_space<vmem>>, %arg3: memref<4x8x32xf32, #tpu.memory_space<vmem>>, %arg4: memref<32x128xf32, #tpu.memory_space<vmem>>, %arg5: memref<128x32xf32, #tpu.memory_space<vmem>>, %arg6: memref<8x128xf32, #tpu.memory_space<vmem>>, %arg7: memref<16x32xf32, #tpu.memory_space<vmem>>) attributes {dimension_semantics = [], scalar_prefetch = 0 : i64, scratch_operands = 0 : i64, tpu.core_type = #tpu.core_type<tc>} {
    %c0 = arith.constant 0 : index
    %c0_0 = arith.constant 0 : index
    %0 = vector.load %arg0[%c0, %c0_0] : memref<16x32xf32, #tpu.memory_space<vmem>>, vector<16x32xf32>
    %c0_1 = arith.constant 0 : index
    %c0_2 = arith.constant 0 : index
    %1 = vector.load %arg6[%c0_1, %c0_2] : memref<8x128xf32, #tpu.memory_space<vmem>>, vector<1x32xf32>
    %c1 = arith.constant 1 : index
    %c0_3 = arith.constant 0 : index
    %2 = vector.load %arg6[%c1, %c0_3] : memref<8x128xf32, #tpu.memory_space<vmem>>, vector<1x32xf32>
    %c2 = arith.constant 2 : index
    %c0_4 = arith.constant 0 : index
    %3 = vector.load %arg6[%c2, %c0_4] : memref<8x128xf32, #tpu.memory_space<vmem>>, vector<1x32xf32>
    %c3 = arith.constant 3 : index
    %c0_5 = arith.constant 0 : index
    %4 = vector.load %arg6[%c3, %c0_5] : memref<8x128xf32, #tpu.memory_space<vmem>>, vector<1x32xf32>
    %c4 = arith.constant 4 : index
    %c0_6 = arith.constant 0 : index
    %5 = vector.load %arg6[%c4, %c0_6] : memref<8x128xf32, #tpu.memory_space<vmem>>, vector<1x32xf32>
    %c5 = arith.constant 5 : index
    %c0_7 = arith.constant 0 : index
    %6 = vector.load %arg6[%c5, %c0_7] : memref<8x128xf32, #tpu.memory_space<vmem>>, vector<1x32xf32>
    %c6 = arith.constant 6 : index
    %c0_8 = arith.constant 0 : index
    %7 = vector.load %arg6[%c6, %c0_8] : memref<8x128xf32, #tpu.memory_space<vmem>>, vector<1x128xf32>
    %cst = arith.constant dense<0.000000e+00> : vector<16xf32>
    %8 = vector.multi_reduction <add>, %0, %cst [1] : vector<16x32xf32> to vector<16xf32>
    %9 = vector.shape_cast %8 : vector<16xf32> to vector<16x1xf32>
    %cst_9 = arith.constant 3.200000e+01 : f32
    %10 = vector.broadcast %cst_9 : f32 to vector<16x1xf32>
    %11 = arith.divf %9, %10 : vector<16x1xf32>
    %12 = vector.broadcast %11 : vector<16x1xf32> to vector<16x32xf32>
    %13 = arith.subf %0, %12 : vector<16x32xf32>
    %14 = arith.mulf %13, %13 : vector<16x32xf32>
    %cst_10 = arith.constant dense<0.000000e+00> : vector<16xf32>
    %15 = vector.multi_reduction <add>, %14, %cst_10 [1] : vector<16x32xf32> to vector<16xf32>
    %16 = vector.shape_cast %15 : vector<16xf32> to vector<16x1xf32>
    %cst_11 = arith.constant 3.200000e+01 : f32
    %17 = vector.broadcast %cst_11 : f32 to vector<16x1xf32>
    %18 = arith.divf %16, %17 : vector<16x1xf32>
    %19 = vector.broadcast %11 : vector<16x1xf32> to vector<16x32xf32>
    %20 = arith.subf %0, %19 : vector<16x32xf32>
    %cst_12 = arith.constant 9.99999974E-6 : f32
    %21 = vector.broadcast %cst_12 : f32 to vector<16x1xf32>
    %22 = arith.addf %18, %21 : vector<16x1xf32>
    %23 = math.rsqrt %22 : vector<16x1xf32>
    %24 = vector.broadcast %23 : vector<16x1xf32> to vector<16x32xf32>
    %25 = arith.mulf %20, %24 : vector<16x32xf32>
    %26 = vector.broadcast %1 : vector<1x32xf32> to vector<16x32xf32>
    %27 = arith.mulf %25, %26 : vector<16x32xf32>
    %28 = vector.broadcast %2 : vector<1x32xf32> to vector<16x32xf32>
    %29 = arith.addf %27, %28 : vector<16x32xf32>
    %30 = vector.shape_cast %29 : vector<16x32xf32> to vector<1x16x32xf32>
    %31 = vector.shape_cast %30 : vector<1x16x32xf32> to vector<1x16x32xf32>
    %32 = vector.broadcast %31 : vector<1x16x32xf32> to vector<12x16x32xf32>
    %c0_13 = arith.constant 0 : index
    %c0_14 = arith.constant 0 : index
    %c0_15 = arith.constant 0 : index
    %33 = vector.load %arg2[%c0_13, %c0_14, %c0_15] : memref<12x32x8xf32, #tpu.memory_space<vmem>>, vector<12x32x8xf32>
    "tpu.trace_start"() <{level = 10 : i32, message = "gnc,gcd->gnd"}> : () -> ()
    %cst_16 = arith.constant dense<0.000000e+00> : vector<12x16x8xf32>
    %34 = tpu.matmul %32, %33, %cst_16 {dimension_numbers = #tpu.dot_dimension_numbers<[2], [1], [1], [2], [0, 0, 0, 1, 1, 2], [0], [0]>} : vector<12x16x32xf32>, vector<12x32x8xf32>, vector<12x16x8xf32> -> vector<12x16x8xf32>
    "tpu.trace_stop"() : () -> ()
    %35 = vector.extract_strided_slice %34 {offsets = [0, 0, 0], sizes = [4, 16, 8], strides = [1, 1, 1]} : vector<12x16x8xf32> to vector<4x16x8xf32>
    %36 = vector.extract_strided_slice %34 {offsets = [4, 0, 0], sizes = [4, 16, 8], strides = [1, 1, 1]} : vector<12x16x8xf32> to vector<4x16x8xf32>
    %37 = vector.extract_strided_slice %34 {offsets = [8, 0, 0], sizes = [4, 16, 8], strides = [1, 1, 1]} : vector<12x16x8xf32> to vector<4x16x8xf32>
    "tpu.trace_start"() <{level = 10 : i32, message = "hqd,hkd->hqk"}> : () -> ()
    %cst_17 = arith.constant dense<0.000000e+00> : vector<4x16x16xf32>
    %38 = tpu.matmul %35, %36, %cst_17 {dimension_numbers = #tpu.dot_dimension_numbers<[2], [2], [1], [1], [0, 0, 0, 1, 1, 1], [0], [0]>} : vector<4x16x8xf32>, vector<4x16x8xf32>, vector<4x16x16xf32> -> vector<4x16x16xf32>
    "tpu.trace_stop"() : () -> ()
    %c0_18 = arith.constant 0 : index
    %c0_19 = arith.constant 0 : index
    %39 = vector.load %arg1[%c0_18, %c0_19] : memref<16x16xf32, #tpu.memory_space<vmem>>, vector<16x16xf32>
    %40 = vector.shape_cast %39 : vector<16x16xf32> to vector<1x16x16xf32>
    %41 = vector.broadcast %40 : vector<1x16x16xf32> to vector<4x16x16xf32>
    %42 = arith.addf %38, %41 : vector<4x16x16xf32>
    %cst_20 = arith.constant dense<0xFF800000> : vector<4x16xf32>
    %43 = vector.multi_reduction <maximumf>, %42, %cst_20 [2] : vector<4x16x16xf32> to vector<4x16xf32>
    %44 = vector.shape_cast %43 : vector<4x16xf32> to vector<4x16x1xf32>
    %45 = vector.broadcast %44 : vector<4x16x1xf32> to vector<4x16x16xf32>
    %46 = arith.subf %42, %45 : vector<4x16x16xf32>
    %47 = math.exp %46 : vector<4x16x16xf32>
    %cst_21 = arith.constant dense<0.000000e+00> : vector<4x16xf32>
    %48 = vector.multi_reduction <add>, %47, %cst_21 [2] : vector<4x16x16xf32> to vector<4x16xf32>
    %49 = vector.shape_cast %48 : vector<4x16xf32> to vector<4x16x1xf32>
    %50 = tpu.reciprocal %49 {approx = true} : vector<4x16x1xf32> -> vector<4x16x1xf32>
    %51 = arith.mulf %49, %50 : vector<4x16x1xf32>
    %cst_22 = arith.constant 2.000000e+00 : f32
    %52 = vector.broadcast %cst_22 : f32 to vector<4x16x1xf32>
    %53 = arith.subf %52, %51 : vector<4x16x1xf32>
    %54 = arith.mulf %50, %53 : vector<4x16x1xf32>
    %55 = vector.broadcast %54 : vector<4x16x1xf32> to vector<4x16x16xf32>
    %56 = arith.mulf %47, %55 : vector<4x16x16xf32>
    "tpu.trace_start"() <{level = 10 : i32, message = "hqk,hkd->hqd"}> : () -> ()
    %cst_23 = arith.constant dense<0.000000e+00> : vector<4x16x8xf32>
    %57 = tpu.matmul %56, %37, %cst_23 {dimension_numbers = #tpu.dot_dimension_numbers<[2], [1], [1], [2], [0, 0, 0, 1, 1, 2], [0], [0]>} : vector<4x16x16xf32>, vector<4x16x8xf32>, vector<4x16x8xf32> -> vector<4x16x8xf32>
    "tpu.trace_stop"() : () -> ()
    %c0_24 = arith.constant 0 : index
    %c0_25 = arith.constant 0 : index
    %c0_26 = arith.constant 0 : index
    %58 = vector.load %arg3[%c0_24, %c0_25, %c0_26] : memref<4x8x32xf32, #tpu.memory_space<vmem>>, vector<4x8x32xf32>
    "tpu.trace_start"() <{level = 10 : i32, message = "hnd,hdc->hnc"}> : () -> ()
    %cst_27 = arith.constant dense<0.000000e+00> : vector<4x16x32xf32>
    %59 = tpu.matmul %57, %58, %cst_27 {dimension_numbers = #tpu.dot_dimension_numbers<[2], [1], [1], [2], [0, 0, 0, 1, 1, 2], [0], [0]>} : vector<4x16x8xf32>, vector<4x8x32xf32>, vector<4x16x32xf32> -> vector<4x16x32xf32>
    "tpu.trace_stop"() : () -> ()
    %cst_28 = arith.constant dense<0.000000e+00> : vector<16x32xf32>
    %60 = vector.multi_reduction <add>, %59, %cst_28 [0] : vector<4x16x32xf32> to vector<16x32xf32>
    %61 = arith.addf %0, %60 : vector<16x32xf32>
    %62 = vector.broadcast %5 : vector<1x32xf32> to vector<16x32xf32>
    %63 = arith.addf %61, %62 : vector<16x32xf32>
    %cst_29 = arith.constant dense<0.000000e+00> : vector<16xf32>
    %64 = vector.multi_reduction <add>, %63, %cst_29 [1] : vector<16x32xf32> to vector<16xf32>
    %65 = vector.shape_cast %64 : vector<16xf32> to vector<16x1xf32>
    %cst_30 = arith.constant 3.200000e+01 : f32
    %66 = vector.broadcast %cst_30 : f32 to vector<16x1xf32>
    %67 = arith.divf %65, %66 : vector<16x1xf32>
    %68 = vector.broadcast %67 : vector<16x1xf32> to vector<16x32xf32>
    %69 = arith.subf %63, %68 : vector<16x32xf32>
    %70 = arith.mulf %69, %69 : vector<16x32xf32>
    %cst_31 = arith.constant dense<0.000000e+00> : vector<16xf32>
    %71 = vector.multi_reduction <add>, %70, %cst_31 [1] : vector<16x32xf32> to vector<16xf32>
    %72 = vector.shape_cast %71 : vector<16xf32> to vector<16x1xf32>
    %cst_32 = arith.constant 3.200000e+01 : f32
    %73 = vector.broadcast %cst_32 : f32 to vector<16x1xf32>
    %74 = arith.divf %72, %73 : vector<16x1xf32>
    %75 = vector.broadcast %67 : vector<16x1xf32> to vector<16x32xf32>
    %76 = arith.subf %63, %75 : vector<16x32xf32>
    %cst_33 = arith.constant 9.99999974E-6 : f32
    %77 = vector.broadcast %cst_33 : f32 to vector<16x1xf32>
    %78 = arith.addf %74, %77 : vector<16x1xf32>
    %79 = math.rsqrt %78 : vector<16x1xf32>
    %80 = vector.broadcast %79 : vector<16x1xf32> to vector<16x32xf32>
    %81 = arith.mulf %76, %80 : vector<16x32xf32>
    %82 = vector.broadcast %3 : vector<1x32xf32> to vector<16x32xf32>
    %83 = arith.mulf %81, %82 : vector<16x32xf32>
    %84 = vector.broadcast %4 : vector<1x32xf32> to vector<16x32xf32>
    %85 = arith.addf %83, %84 : vector<16x32xf32>
    %c0_34 = arith.constant 0 : index
    %c0_35 = arith.constant 0 : index
    %86 = vector.load %arg4[%c0_34, %c0_35] : memref<32x128xf32, #tpu.memory_space<vmem>>, vector<32x128xf32>
    %cst_36 = arith.constant dense<0.000000e+00> : vector<16x128xf32>
    %87 = tpu.matmul %85, %86, %cst_36 {dimension_numbers = #tpu.dot_dimension_numbers<[1], [0], [0], [1], [0, 0, 1, 1], [], []>} : vector<16x32xf32>, vector<32x128xf32>, vector<16x128xf32> -> vector<16x128xf32>
    %88 = vector.broadcast %7 : vector<1x128xf32> to vector<16x128xf32>
    %89 = arith.addf %87, %88 : vector<16x128xf32>
    %cst_37 = arith.constant 0.000000e+00 : f32
    %90 = vector.broadcast %cst_37 : f32 to vector<16x128xf32>
    %91 = arith.maximumf %89, %90 : vector<16x128xf32>
    %c0_38 = arith.constant 0 : index
    %c0_39 = arith.constant 0 : index
    %92 = vector.load %arg5[%c0_38, %c0_39] : memref<128x32xf32, #tpu.memory_space<vmem>>, vector<128x32xf32>
    %cst_40 = arith.constant dense<0.000000e+00> : vector<16x32xf32>
    %93 = tpu.matmul %91, %92, %cst_40 {dimension_numbers = #tpu.dot_dimension_numbers<[1], [0], [0], [1], [0, 0, 1, 1], [], []>} : vector<16x128xf32>, vector<128x32xf32>, vector<16x32xf32> -> vector<16x32xf32>
    %94 = vector.broadcast %6 : vector<1x32xf32> to vector<16x32xf32>
    %95 = arith.addf %93, %94 : vector<16x32xf32>
    %96 = arith.addf %63, %95 : vector<16x32xf32>
    %c0_41 = arith.constant 0 : index
    %c0_42 = arith.constant 0 : index
    %97 = vector.load %arg7[%c0_41, %c0_42] : memref<16x32xf32, #tpu.memory_space<vmem>>, vector<16x32xf32>
    tpu.vector_store %arg7[%c0_41, %c0_42], %96 {strides = array<i32>} : memref<16x32xf32, #tpu.memory_space<vmem>>, vector<16x32xf32>,
    return
  }
}

</mosaic_0001>

<bundles_post_ra>
// kernel: tpu_custom_call.1
= control target key start
LH: loop header
LB: loop body
LE: loop exit
PB: predicated region body
PF: predicated region fallthrough
CT: control target
= control target key end

     0   :  { %vm36_vm0 = vcmask 261120   ;;  %s3610_s0 = inlined_call_operand.vmem [shape: f32[16,32], index: 0, kind: input, shape index: {}]   ;;  %s3611_s1 = inlined_call_operand.vmem [shape: f32[16,16], index: 1, kind: input, shape index: {}]   ;;  %s3612_s2 = inlined_call_operand.vmem [shape: f32[12,32,8], index: 2, kind: input, shape index: {}]   ;;  %s3613_s3 = inlined_call_operand.vmem [shape: f32[4,8,32], index: 3, kind: input, shape index: {}]   ;;  %s3614_s4 = inlined_call_operand.vmem [shape: f32[32,128], index: 4, kind: input, shape index: {}]   ;;  %s3615_s5 = inlined_call_operand.vmem [shape: f32[128,32], index: 5, kind: input, shape index: {}]   ;;  %s3616_s6 = inlined_call_operand.vmem [shape: f32[8,128], index: 6, kind: input, shape index: {}]   ;;  %s3617_s7 = inlined_call_operand.hbm [shape: f32[16,32], index: 7, kind: output, shape index: {}]  }
   0x1   :  { %v3160_v0 = vld [vmem:[%s3610_s0] sm:$0xff]  ;;  %v3165_v1 = vld [vmem:[%s3610_s0 + $0x8] sm:$0xff] }
   0x2   :  { %12 = vsyncpa [#allocation3], 0  ;;  %v37_v2 = vsel %vm36_vm0, %v3160_v0, 0.0  ;;  %v40_v3 = vsel %vm36_vm0, %v3165_v1, 0.0  ;;  %v76_v14 = vld [vmem:[%s3612_s2] sm:$0xff]  ;;  %v77_v15 = vld [vmem:[%s3612_s2 + $0x8] sm:$0xff] }
   0x3   :  { %38 = vadd.xlane.f32.xlu0 %v37_v2  ;;  %v88_v16 = vld [vmem:[%s3612_s2 + $0x60] sm:$0xff]  ;;  %v2871_v17 = vpack.c.bf16 %v77_v15, %v76_v14  ;;  %v89_v18 = vld [vmem:[%s3612_s2 + $0x68] sm:$0xff]  ;;  %v78_v20 = vld [vmem:[%s3612_s2 + $0x10] sm:$0xff]  ;;  %vm1032_vm1 = vcmask 64512   ;;  %vm1381_vm3 = vcmask 130048  }
   0x4   :  { %v2895_v19 = vpack.c.bf16 %v89_v18, %v88_v16  ;;  %v79_v21 = vld [vmem:[%s3612_s2 + $0x18] sm:$0xff]  ;;  %v90_v22 = vld [vmem:[%s3612_s2 + $0x70] sm:$0xff]  ;;  %v80_v26 = vld [vmem:[%s3612_s2 + $0x20] sm:$0xff] }
   0x5   :  { %2872 = vmatprep.subr.bf16.mxu0 %v2871_v17  ;;  %v2875_v23 = vpack.c.bf16 %v79_v21, %v78_v20  ;;  %v91_v24 = vld [vmem:[%s3612_s2 + $0x78] sm:$0xff]  ;;  %v81_v27 = vld [vmem:[%s3612_s2 + $0x28] sm:$0xff]  ;;  %v96_v28 = vld [vmem:[%s3612_s2 + $0xa0] sm:$0xff] }
   0x6   :  { %2896 = vmatprep.subr.bf16.mxu1 %v2895_v19  ;;  %2874 = vmatpush3.bf16.msra.mxu0 %v2871_v17  ;;  %v2899_v25 = vpack.c.bf16 %v91_v24, %v90_v22  ;;  %v2879_v29 = vpack.c.bf16 %v81_v27, %v80_v26  ;;  %v97_v30 = vld [vmem:[%s3612_s2 + $0xa8] sm:$0xff]  ;;  %v2412_v39 = vld [vmem:[%s3616_s6] ss:$0 sm:$0xff]  ;;  %v2413_v41 = vld [vmem:[%s3616_s6 + $0x1] ss:$0 sm:$0xff] }
   0x7   :  { %41 = vadd.xlane.f32.xlu0 %v40_v3  ;;  %2898 = vmatpush3.bf16.msra.mxu1 %v2895_v19  ;;  %v2911_v31 = vpack.c.bf16 %v97_v30, %v96_v28  ;;  %v82_v46 = vld [vmem:[%s3612_s2 + $0x30] sm:$0xff]  ;;  %v83_v48 = vld [vmem:[%s3612_s2 + $0x38] sm:$0xff]  ;;  %v84_v52 = vld [vmem:[%s3612_s2 + $0x40] sm:$0xff] }
   0x8   :  { %2876 = vmatprep.subr.bf16.mxu0 %v2875_v23  ;;  %2900 = vmatprep.subr.bf16.mxu1 %v2899_v25  ;;  %v98_v49 = vld [vmem:[%s3612_s2 + $0xb0] sm:$0xff]  ;;  %v99_v50 = vld [vmem:[%s3612_s2 + $0xb8] sm:$0xff]  ;;  %v2883_v53 = vpack.c.bf16 %v83_v48, %v82_v46  ;;  %v85_v55 = vld [vmem:[%s3612_s2 + $0x48] sm:$0xff] }
   0x9   :  { %v2915_v54 = vpack.c.bf16 %v99_v50, %v98_v49  ;;  %v104_v56 = vld [vmem:[%s3612_s2 + $0xe0] sm:$0xff]  ;;  %v105_v57 = vld [vmem:[%s3612_s2 + $0xe8] sm:$0xff]  ;;  %v2887_v58 = vpack.c.bf16 %v85_v55, %v84_v52  ;;  %v86_v60 = vld [vmem:[%s3612_s2 + $0x50] sm:$0xff] }
   0xa   :  { %2878 = vmatpush3.bf16.msra.mxu0 %v2875_v23  ;;  %v2927_v59 = vpack.c.bf16 %v105_v57, %v104_v56  ;;  %v87_v61 = vld [vmem:[%s3612_s2 + $0x58] sm:$0xff]  ;;  %v106_v62 = vld [vmem:[%s3612_s2 + $0xf0] sm:$0xff]  ;;  %v100_v15 = vld [vmem:[%s3612_s2 + $0xc0] sm:$0xff] }
   0xb   :  { %2902 = vmatpush3.bf16.msra.mxu1 %v2899_v25  ;;  %2880 = vmatprep.subr.bf16.mxu0 %v2879_v29  ;;  %v107_v63 = vld [vmem:[%s3612_s2 + $0xf8] sm:$0xff]  ;;  %v2891_v2 = vpack.c.bf16 %v87_v61, %v86_v60  ;;  %v101_v16 = vld [vmem:[%s3612_s2 + $0xc8] sm:$0xff]  ;;  %v120_v18 = vld [vmem:[%s3612_s2 + $0x160] sm:$0xff] }
   0xc   :  { %2912 = vmatprep.subr.bf16.mxu1 %v2911_v31  ;;  %v2931_v3 = vpack.c.bf16 %v107_v63, %v106_v62  ;;  %v121_v19 = vld [vmem:[%s3612_s2 + $0x168] sm:$0xff]  ;;  %v2919_v20 = vpack.c.bf16 %v101_v16, %v100_v15  ;;  %v102_v22 = vld [vmem:[%s3612_s2 + $0xd0] sm:$0xff]  ;;  %v103_v23 = vld [vmem:[%s3612_s2 + $0xd8] sm:$0xff] }
   0xd   :  { %v2959_v21 = vpack.c.bf16 %v121_v19, %v120_v18  ;;  %v122_v24 = vld [vmem:[%s3612_s2 + $0x170] sm:$0xff]  ;;  %v123_v25 = vld [vmem:[%s3612_s2 + $0x178] sm:$0xff]  ;;  %v2923_v26 = vpack.c.bf16 %v103_v23, %v102_v22  ;;  %v108_v27 = vld [vmem:[%s3612_s2 + $0x100] sm:$0xff] }
   0xe   :  { %v109_v28 = vld [vmem:[%s3612_s2 + $0x108] sm:$0xff]  ;;  %vm3380_vm2 = vmpackc.low %vm1032_vm1, %vm1032_vm1 }
   0xf   :  { %v2935_v30 = vpack.c.bf16 %v109_v28, %v108_v27  ;;  %v1031_v15 = vld [vmem:[%s3611_s1 + $0x8] sm:$0xff] }
  0x90   :  { %v39_v4 = vpop.xlane.xlu0 %38 }
  0x91   :  { %v44_v5 = vmul.f32 0.03125, %v39_v4  ;;  %v92_v4 = vld [vmem:[%s3612_s2 + $0x80] sm:$0xff] }
  0x93   :  { %v46_v6 = vsub.f32 %v3160_v0, %v44_v5  ;;  %v93_v5 = vld [vmem:[%s3612_s2 + $0x88] sm:$0xff] }
  0x94   :  { %v42_v7 = vpop.xlane.xlu0 %41 }
  0x95   :  { %v45_v8 = vmul.f32 0.03125, %v42_v7  ;;  %v48_v9 = vmul.f32 %v46_v6, %v46_v6  ;;  %v113_v7 = vld [vmem:[%s3612_s2 + $0x128] sm:$0xff] }
  0x97   :  { %v47_v10 = vsub.f32 %v3165_v1, %v45_v8  ;;  %v50_v11 = vsel %vm36_vm0, %v48_v9, 0.0  ;;  %v2903_v8 = vpack.c.bf16 %v93_v5, %v92_v4 }
  0x98   :  { %51 = vadd.xlane.f32.xlu1 %v50_v11  ;;  %v95_v11 = vld [vmem:[%s3612_s2 + $0x98] sm:$0xff] }
  0x99   :  { %v49_v12 = vmul.f32 %v47_v10, %v47_v10 }
  0x9b   :  { %v53_v13 = vsel %vm36_vm0, %v49_v12, 0.0  ;;  %v114_v12 = vld [vmem:[%s3612_s2 + $0x130] sm:$0xff] }
  0x9c   :  { %54 = vadd.xlane.f32.xlu1 %v53_v13  ;;  %v115_v13 = vld [vmem:[%s3612_s2 + $0x138] sm:$0xff] }
  0x9d   :  { %v2947_v17 = vpack.c.bf16 %v115_v13, %v114_v12 }
 0x125   :  { %v52_v32 = vpop.xlane.xlu1 %51 }
 0x126   :  { %v56_v33 = vmul.f32 0.03125, %v52_v32  ;;  %v111_v32 = vld [vmem:[%s3612_s2 + $0x118] sm:$0xff] }
 0x128   :  { %v58_v34 = vadd.f32 1e-05, %v56_v33 }
 0x129   :  { %v55_v35 = vpop.xlane.xlu1 %54 }
 0x12a   :  { %3050 = vrsqrt.f32 %v58_v34  ;;  %v57_v36 = vmul.f32 0.03125, %v55_v35  ;;  %v116_v34 = vld [vmem:[%s3612_s2 + $0x140] sm:$0xff]  ;;  %v117_v35 = vld [vmem:[%s3612_s2 + $0x148] sm:$0xff] }
 0x12c   :  { %v59_v37 = vadd.f32 1e-05, %v57_v36  ;;  %v2951_v36 = vpack.c.bf16 %v117_v35, %v116_v34 }
 0x12e   :  { %3052 = vrsqrt.f32 %v59_v37  ;;  %v118_v37 = vld [vmem:[%s3612_s2 + $0x150] sm:$0xff] }
 0x134   :  { %v3051_v38 = vpop.eup %3050 }
 0x135   :  { %v62_v40 = vmul.f32 %v3051_v38, %v46_v6  ;;  %v112_v6 = vld [vmem:[%s3612_s2 + $0x120] sm:$0xff]  ;;  %v119_v38 = vld [vmem:[%s3612_s2 + $0x158] sm:$0xff] }
 0x136   :  { %v2943_v9 = vpack.c.bf16 %v113_v7, %v112_v6 }
 0x137   :  { %v68_v42 = vmul.f32 %v2412_v39, %v62_v40 }
 0x138   :  { %v3053_v43 = vpop.eup %3052 }
 0x139   :  { %v3217_v44 = vadd.f32 %v2413_v41, %v68_v42  ;;  %v63_v45 = vmul.f32 %v3053_v43, %v47_v10  ;;  %v94_v10 = vld [vmem:[%s3612_s2 + $0x90] sm:$0xff] }
 0x13a   :  { %v2907_v14 = vpack.c.bf16 %v95_v11, %v94_v10 }
 0x13b   :  { %v69_v47 = vmul.f32 %v2412_v39, %v63_v45  ;;  %2625 = vmatprep.mubr.msk.f32.mxu0 %vm36_vm0, %v3217_v44  ;;  %2658 = vmatprep.mubr.msk.f32.mxu1 %vm36_vm0, %v3217_v44  ;;  %v2955_v39 = vpack.c.bf16 %v119_v38, %v118_v37 }
 0x13d   :  { %v3235_v51 = vadd.f32 %v2413_v41, %v69_v47 }
 0x13f   :  { %2626 = vmatmul.mubr.msk.f32.vlgmr.msra.gmra.mrb[0].mxu0 %vm36_vm0, %v3235_v51  ;;  %2659 = vmatmul.mubr.msk.f32.vlgmr.msra.gmra.mrb[0].mxu1 %vm36_vm0, %v3235_v51 }
 0x140   :  { %2882 = vmatpush3.bf16.msra.mxu0 %v2879_v29  ;;  %2914 = vmatpush3.bf16.msra.mxu1 %v2911_v31  ;;  %v2963_v29 = vpack.c.bf16 %v123_v25, %v122_v24  ;;  %v110_v31 = vld [vmem:[%s3612_s2 + $0x110] sm:$0xff] }
 0x141   :  { %2636 = vmatprep.mubr.msk.f32.mxu0 %vm36_vm0, %v3217_v44  ;;  %2680 = vmatprep.mubr.msk.f32.mxu1 %vm36_vm0, %v3217_v44  ;;  %v2939_v33 = vpack.c.bf16 %v111_v32, %v110_v31 }
 0x142   :  { %2884 = vmatprep.subr.bf16.mxu0 %v2883_v53  ;;  %2916 = vmatprep.subr.bf16.mxu1 %v2915_v54 }
 0x144   :  { %2886 = vmatpush3.bf16.msra.mxu0 %v2883_v53  ;;  %2918 = vmatpush3.bf16.msra.mxu1 %v2915_v54 }
 0x145   :  { %2888 = vmatprep.subr.bf16.mxu0 %v2887_v58  ;;  %2928 = vmatprep.subr.bf16.mxu1 %v2927_v59 }
 0x147   :  { %2637 = vmatmul.mubr.msk.f32.vlgmr.msra.gmra.mrb[2].mxu0 %vm36_vm0, %v3235_v51  ;;  %2681 = vmatmul.mubr.msk.f32.vlgmr.msra.gmra.mrb[2].mxu1 %vm36_vm0, %v3235_v51 }
 0x148   :  { %2890 = vmatpush3.bf16.msra.mxu0 %v2887_v58  ;;  %2647 = vmatprep.mubr.msk.f32.mxu0 %vm36_vm0, %v3217_v44 }
 0x149   :  { %2930 = vmatpush3.bf16.msra.mxu1 %v2927_v59  ;;  %2702 = vmatprep.mubr.msk.f32.mxu1 %vm36_vm0, %v3217_v44 }
 0x14a   :  { %2892 = vmatprep.subr.bf16.mxu0 %v2891_v2  ;;  %2932 = vmatprep.subr.bf16.mxu1 %v2931_v3 }
 0x14c   :  { %2894 = vmatpush3.bf16.msra.mxu0 %v2891_v2 }
 0x14d   :  { %2934 = vmatpush3.bf16.msra.mxu1 %v2931_v3  ;;  %2904 = vmatprep.subr.bf16.mxu0 %v2903_v8 }
 0x14e   :  { %2944 = vmatprep.subr.bf16.mxu1 %v2943_v9 }
 0x14f   :  { %2648 = vmatmul.mubr.msk.f32.vlgmr.msra.gmra.mrb[4].mxu0 %vm36_vm0, %v3235_v51 }
 0x150   :  { %2703 = vmatmul.mubr.msk.f32.vlgmr.msra.gmra.mrb[4].mxu1 %vm36_vm0, %v3235_v51  ;;  %2906 = vmatpush3.bf16.msra.mxu0 %v2903_v8 }
 0x151   :  { %2669 = vmatprep.mubr.msk.f32.mxu0 %vm36_vm0, %v3217_v44  ;;  %2946 = vmatpush3.bf16.msra.mxu1 %v2943_v9 }
 0x152   :  { %2724 = vmatprep.mubr.msk.f32.mxu1 %vm36_vm0, %v3217_v44  ;;  %2908 = vmatprep.subr.bf16.mxu0 %v2907_v14 }
 0x153   :  { %2948 = vmatprep.subr.bf16.mxu1 %v2947_v17 }
 0x154   :  { %2910 = vmatpush3.bf16.msra.mxu0 %v2907_v14 }
 0x155   :  { %2950 = vmatpush3.bf16.msra.mxu1 %v2947_v17  ;;  %2920 = vmatprep.subr.bf16.mxu0 %v2919_v20  ;;  %v1030_v17 = vld [vmem:[%s3611_s1] sm:$0xff] }
 0x156   :  { %2960 = vmatprep.subr.bf16.mxu1 %v2959_v21 }
 0x157   :  { %2670 = vmatmul.mubr.msk.f32.vlgmr.msra.gmra.mrb[6].mxu0 %vm36_vm0, %v3235_v51 }
 0x158   :  { %2725 = vmatmul.mubr.msk.f32.vlgmr.msra.gmra.mrb[6].mxu1 %vm36_vm0, %v3235_v51  ;;  %2922 = vmatpush3.bf16.msra.mxu0 %v2919_v20 }
 0x159   :  { %2691 = vmatprep.mubr.msk.f32.mxu0 %vm36_vm0, %v3217_v44  ;;  %2962 = vmatpush3.bf16.msra.mxu1 %v2959_v21 }
 0x15a   :  { %2746 = vmatprep.mubr.msk.f32.mxu1 %vm36_vm0, %v3217_v44  ;;  %2924 = vmatprep.subr.bf16.mxu0 %v2923_v26 }
 0x15b   :  { %2964 = vmatprep.subr.bf16.mxu1 %v2963_v29 }
 0x15c   :  { %2926 = vmatpush3.bf16.msra.mxu0 %v2923_v26 }
 0x15d   :  { %2966 = vmatpush3.bf16.msra.mxu1 %v2963_v29  ;;  %2936 = vmatprep.subr.bf16.mxu0 %v2935_v30 }
 0x15f   :  { %2692 = vmatmul.mubr.msk.f32.vlgmr.msra.gmra.mrb[8].mxu0 %vm36_vm0, %v3235_v51 }
 0x160   :  { %2747 = vmatmul.mubr.msk.f32.vlgmr.msra.gmra.mrb[8].mxu1 %vm36_vm0, %v3235_v51  ;;  %2938 = vmatpush3.bf16.msra.mxu0 %v2935_v30 }
 0x161   :  { %2713 = vmatprep.mubr.msk.f32.mxu0 %vm36_vm0, %v3217_v44  ;;  %2940 = vmatprep.subr.bf16.mxu0 %v2939_v33 }
 0x164   :  { %2942 = vmatpush3.bf16.msra.mxu0 %v2939_v33 }
 0x165   :  { %2952 = vmatprep.subr.bf16.mxu0 %v2951_v36 }
 0x167   :  { %2714 = vmatmul.mubr.msk.f32.vlgmr.msra.gmra.mrb[10].mxu0 %vm36_vm0, %v3235_v51 }
 0x168   :  { %2954 = vmatpush3.bf16.msra.mxu0 %v2951_v36  ;;  %2735 = vmatprep.mubr.msk.f32.mxu0 %vm36_vm0, %v3217_v44 }
 0x169   :  { %2956 = vmatprep.subr.bf16.mxu0 %v2955_v39 }
 0x16c   :  { %2958 = vmatpush3.bf16.msra.mxu0 %v2955_v39 }
 0x16f   :  { %2736 = vmatmul.mubr.msk.f32.vlgmr.msra.gmra.mrb[12].mxu0 %vm36_vm0, %v3235_v51 }
 0x212   :  { %v2627_v40 = vpop.f32.mrb[0].mxu0  ;;  %v2660_v41 = vpop.f32.mrb[0].mxu1 }
 0x213   :  { %v196_v42 = vpop.f32.mrb[1].mxu0  ;;  %v421_v43 = vpop.f32.mrb[1].mxu1 }
 0x214   :  { %2753 = vmatprep.mubr.msk.f32.mxu0 %vm1032_vm1, %v196_v42 }
 0x21a   :  { %v2638_v45 = vpop.f32.mrb[2].mxu0  ;;  %v2682_v46 = vpop.f32.mrb[2].mxu1 }
 0x21b   :  { %v271_v47 = vpop.f32.mrb[3].mxu0  ;;  %v571_v48 = vpop.f32.mrb[3].mxu1 }
 0x21c   :  { %v2973_v49 = vpack.c.bf16 %v2682_v46, %v571_v48  ;;  %2760 = vmatprep.mubr.msk.f32.mxu1 %vm1032_vm1, %v271_v47 }
 0x21e   :  { %2975 = vmatprep.subr.msk.bf16.mxu1 %vm3380_vm2, %v2973_v49 }
 0x21f   :  { %2978 = vmatpush3.bf16.xpose.msk.msra.mxu1 %vm3380_vm2, %v2973_v49 }
 0x222   :  { %v2649_v50 = vpop.f32.mrb[4].mxu0 }
 0x223   :  { %v2704_v51 = vpop.f32.mrb[4].mxu1  ;;  %v346_v52 = vpop.f32.mrb[5].mxu0 }
 0x224   :  { %v721_v53 = vpop.f32.mrb[5].mxu1 }
 0x225   :  { %v2985_v54 = vpack.c.bf16 %v2704_v51, %v721_v53 }
 0x226   :  { %2761 = vmatmul.mubr.msk.f32.vlgmr.msra.gmra.mrb[10].mxu1 %vm1032_vm1, %v2638_v45 }
 0x227   :  { %2987 = vmatprep.subr.msk.bf16.mxu1 %vm3380_vm2, %v2985_v54  ;;  %2774 = vmatprep.mubr.msk.f32.mxu1 %vm1032_vm1, %v421_v43 }
 0x228   :  { %2990 = vmatpush3.bf16.xpose.msk.msra.mxu1 %vm3380_vm2, %v2985_v54 }
 0x22a   :  { %v2671_v55 = vpop.f32.mrb[6].mxu0 }
 0x22b   :  { %v2726_v56 = vpop.f32.mrb[6].mxu1  ;;  %v496_v57 = vpop.f32.mrb[7].mxu0 }
 0x22c   :  { %v2967_v58 = vpack.c.bf16 %v2671_v55, %v496_v57  ;;  %v871_v59 = vpop.f32.mrb[7].mxu1 }
 0x22d   :  { %v3395_v60 = vpack.c.bf16 %v2726_v56, %v871_v59 }
 0x22e   :  { %2969 = vmatprep.subr.msk.bf16.mxu0 %vm3380_vm2, %v2967_v58 }
 0x22f   :  { %2775 = vmatmul.mubr.msk.f32.vlgmr.msra.gmra.mrb[12].mxu1 %vm1032_vm1, %v2660_v41  ;;  %2972 = vmatpush3.bf16.xpose.msk.msra.mxu0 %vm3380_vm2, %v2967_v58 }
 0x232   :  { %v2693_v61 = vpop.f32.mrb[8].mxu0 }
 0x233   :  { %v2748_v62 = vpop.f32.mrb[8].mxu1  ;;  %v646_v63 = vpop.f32.mrb[9].mxu0 }
 0x234   :  { %v2979_v2 = vpack.c.bf16 %v2693_v61, %v646_v63  ;;  %v1021_v3 = vpop.f32.mrb[9].mxu1 }
 0x235   :  { %v3003_v4 = vpack.c.bf16 %v2748_v62, %v1021_v3 }
 0x236   :  { %2754 = vmatmul.mubr.msk.f32.vlgmr.msra.gmra.mrb[14].mxu0 %vm1032_vm1, %v2627_v40  ;;  %2981 = vmatprep.subr.msk.bf16.mxu0 %vm3380_vm2, %v2979_v2 }
 0x237   :  { %3004 = vmatprep.subr.bf16.mxu1 %v3003_v4  ;;  %2984 = vmatpush3.bf16.xpose.msk.msra.mxu0 %vm3380_vm2, %v2979_v2 }
 0x238   :  { %2767 = vmatprep.mubr.msk.f32.mxu0 %vm1032_vm1, %v346_v52  ;;  %3006 = vmatpush3.bf16.msra.mxu1 %v3003_v4 }
 0x23a   :  { %v2715_v5 = vpop.f32.mrb[10].mxu0 }
 0x23b   :  { %v796_v6 = vpop.f32.mrb[11].mxu0 }
 0x23c   :  { %v2991_v7 = vpack.c.bf16 %v2715_v5, %v796_v6 }
 0x23e   :  { %2768 = vmatmul.mubr.msk.f32.vlgmr.msra.gmra.mrb[16].mxu0 %vm1032_vm1, %v2649_v50  ;;  %2992 = vmatprep.subr.bf16.mxu0 %v2991_v7 }
 0x23f   :  { %2994 = vmatpush3.bf16.msra.mxu0 %v2991_v7 }
 0x240   :  { %2996 = vmatprep.subr.bf16.mxu0 %v3395_v60 }
 0x242   :  { %v2737_v8 = vpop.f32.mrb[12].mxu0 }
 0x243   :  { %v946_v9 = vpop.f32.mrb[13].mxu0 }
 0x244   :  { %v3410_v10 = vpack.c.bf16 %v2737_v8, %v946_v9 }
 0x2f9   :  { %v2762_v11 = vpop.f32.mrb[10].mxu1 }
 0x2fa   :  { %v1198_v12 = vpop.f32.mrb[11].mxu1  ;;  %v1204_v21 = vadd.f32 %v2762_v11, %v1031_v15 }
 0x2fb   :  { %v1199_v23 = vadd.f32 %v1198_v12, %v1030_v17 }
 0x2fc   :  { %v1391_v25 = vsel %vm1381_vm3, %v1204_v21, -inf }
 0x2fd   :  { %v1388_v27 = vsel %vm1381_vm3, %v1199_v23, -inf }
 0x302   :  { %v2776_v13 = vpop.f32.mrb[12].mxu1 }
 0x303   :  { %v1372_v14 = vpop.f32.mrb[13].mxu1  ;;  %v1378_v31 = vadd.f32 %v2776_v13, %v1031_v15 }
 0x304   :  { %v1373_v33 = vadd.f32 %v1372_v14, %v1030_v17 }
 0x305   :  { %v1403_v35 = vsel %vm1381_vm3, %v1378_v31, -inf }
 0x306   :  { %v1400_v36 = vsel %vm1381_vm3, %v1373_v33, -inf }
 0x309   :  { %v2755_v16 = vpop.f32.mrb[14].mxu0 }
 0x30a   :  { %v1117_v18 = vadd.f32 %v2755_v16, %v1031_v15  ;;  %v1111_v19 = vpop.f32.mrb[15].mxu0 }
 0x30b   :  { %v1112_v20 = vadd.f32 %v1111_v19, %v1030_v17 }
 0x30c   :  { %v1385_v22 = vsel %vm1381_vm3, %v1117_v18, -inf }
 0x30d   :  { %1386 = vmax.xlane.f32.xlu1 %v1385_v22  ;;  %v1382_v24 = vsel %vm1381_vm3, %v1112_v20, -inf }
 0x30e   :  { %1383 = vmax.xlane.f32.xlu0 %v1382_v24 }
 0x311   :  { %1392 = vmax.xlane.f32.xlu1 %v1391_v25  ;;  %v2769_v26 = vpop.f32.mrb[16].mxu0 }
 0x312   :  { %v1291_v28 = vadd.f32 %v2769_v26, %v1031_v15  ;;  %v1285_v29 = vpop.f32.mrb[17].mxu0  ;;  %1389 = vmax.xlane.f32.xlu0 %v1388_v27 }
 0x313   :  { %v1286_v30 = vadd.f32 %v1285_v29, %v1030_v17 }
 0x314   :  { %v1397_v32 = vsel %vm1381_vm3, %v1291_v28, -inf }
 0x315   :  { %1398 = vmax.xlane.f32.xlu1 %v1397_v32  ;;  %v1394_v34 = vsel %vm1381_vm3, %v1286_v30, -inf }
 0x316   :  { %1395 = vmax.xlane.f32.xlu0 %v1394_v34 }
 0x319   :  { %1404 = vmax.xlane.f32.xlu1 %v1403_v35 }
 0x31a   :  { %1401 = vmax.xlane.f32.xlu0 %v1400_v36 }
 0x39a   :  { %v1387_v37 = vpop.xlane.xlu1 %1386 }
 0x39b   :  { %v1407_v38 = vsub.f32 %v1117_v18, %v1387_v37  ;;  %v1384_v39 = vpop.xlane.xlu0 %1383 }
 0x39c   :  { %v1406_v40 = vsub.f32 %v1112_v20, %v1384_v39 }
 0x39d   :  { %v1416_v41 = vmul.f32 1.442695, %v1407_v38 }
 0x39e   :  { %v1414_v42 = vmul.f32 1.442695, %v1406_v40  ;;  %v1393_v43 = vpop.xlane.xlu1 %1392 }
 0x39f   :  { %3054 = vpow2.f32 %v1416_v41  ;;  %v1409_v45 = vsub.f32 %v1204_v21, %v1393_v43  ;;  %v1390_v46 = vpop.xlane.xlu0 %1389 }
 0x3a0   :  { %3056 = vpow2.f32 %v1414_v42  ;;  %v1408_v47 = vsub.f32 %v1199_v23, %v1390_v46 }
 0x3a1   :  { %v1420_v48 = vmul.f32 1.442695, %v1409_v45 }
 0x3a2   :  { %v1418_v44 = vmul.f32 1.442695, %v1408_v47  ;;  %v1399_v49 = vpop.xlane.xlu1 %1398 }
 0x3a3   :  { %3058 = vpow2.f32 %v1420_v48  ;;  %v1411_v50 = vsub.f32 %v1291_v28, %v1399_v49  ;;  %v1396_v51 = vpop.xlane.xlu0 %1395 }
 0x3a4   :  { %3060 = vpow2.f32 %v1418_v44  ;;  %v1410_v52 = vsub.f32 %v1286_v30, %v1396_v51 }
 0x3a5   :  { %v1424_v53 = vmul.f32 1.442695, %v1411_v50 }
 0x3a6   :  { %v1422_v54 = vmul.f32 1.442695, %v1410_v52  ;;  %v1405_v55 = vpop.xlane.xlu1 %1404 }
 0x3a7   :  { %3062 = vpow2.f32 %v1424_v53  ;;  %v1413_v56 = vsub.f32 %v1378_v31, %v1405_v55  ;;  %v1402_v57 = vpop.xlane.xlu0 %1401 }
 0x3a8   :  { %3064 = vpow2.f32 %v1422_v54  ;;  %v1412_v58 = vsub.f32 %v1373_v33, %v1402_v57 }
 0x3a9   :  { %v3055_v59 = vpop.eup %3054  ;;  %v1428_v61 = vmul.f32 1.442695, %v1413_v56 }
 0x3aa   :  { %v3057_v62 = vpop.eup %3056  ;;  %v1426_v63 = vmul.f32 1.442695, %v1412_v58  ;;  %v1433_v2 = vsel %vm1381_vm3, %v3055_v59, 0.0 }
 0x3ab   :  { %3066 = vpow2.f32 %v1428_v61  ;;  %1434 = vadd.xlane.f32.xlu1 %v1433_v2  ;;  %v1430_v3 = vsel %vm1381_vm3, %v3057_v62, 0.0 }
 0x3ac   :  { %3068 = vpow2.f32 %v1426_v63  ;;  %1431 = vadd.xlane.f32.xlu0 %v1430_v3  ;;  %v1819_v3 = vld [vmem:[%s3613_s3 + $0x8] sm:$0xff] }
 0x3ad   :  { %v3428_v4 = vpop.eup %3058  ;;  %2810 = vmatprep.subr.mxu1 %v1819_v3 }
 0x3ae   :  { %v3061_v5 = vpop.eup %3060  ;;  %v1439_v6 = vsel %vm1381_vm3, %v3428_v4, 0.0 }
 0x3af   :  { %1440 = vadd.xlane.f32.xlu1 %v1439_v6  ;;  %v1436_v7 = vsel %vm1381_vm3, %v3061_v5, 0.0 }
 0x3b0   :  { %1437 = vadd.xlane.f32.xlu0 %v1436_v7 }
 0x3b1   :  { %v3433_v8 = vpop.eup %3062 }
 0x3b2   :  { %v3435_v9 = vpop.eup %3064  ;;  %v1445_v11 = vsel %vm1381_vm3, %v3433_v8, 0.0 }
 0x3b3   :  { %1446 = vadd.xlane.f32.xlu1 %v1445_v11  ;;  %v1442_v12 = vsel %vm1381_vm3, %v3435_v9, 0.0 }
 0x3b4   :  { %1443 = vadd.xlane.f32.xlu0 %v1442_v12 }
 0x3b5   :  { %v3441_v13 = vpop.eup %3066 }
 0x3b6   :  { %v3443_v14 = vpop.eup %3068  ;;  %v1451_v15 = vsel %vm1381_vm3, %v3441_v13, 0.0 }
 0x3b7   :  { %1452 = vadd.xlane.f32.xlu1 %v1451_v15  ;;  %v1448_v16 = vsel %vm1381_vm3, %v3443_v14, 0.0 }
 0x3b8   :  { %1449 = vadd.xlane.f32.xlu0 %v1448_v16 }
 0x438   :  { %v1435_v17 = vpop.xlane.xlu1 %1434 }
 0x439   :  { %3070 = vrcp.f32 %v1435_v17  ;;  %v1432_v18 = vpop.xlane.xlu0 %1431 }
 0x43a   :  { %3072 = vrcp.f32 %v1432_v18 }
 0x43c   :  { %v1441_v19 = vpop.xlane.xlu1 %1440 }
 0x43d   :  { %3074 = vrcp.f32 %v1441_v19  ;;  %v1438_v20 = vpop.xlane.xlu0 %1437 }
 0x43e   :  { %3076 = vrcp.f32 %v1438_v20 }
 0x440   :  { %v1447_v21 = vpop.xlane.xlu1 %1446 }
 0x441   :  { %3078 = vrcp.f32 %v1447_v21  ;;  %v1444_v22 = vpop.xlane.xlu0 %1443 }
 0x442   :  { %3080 = vrcp.f32 %v1444_v22 }
 0x443   :  { %v3071_v23 = vpop.eup %3070 }
 0x444   :  { %v3073_v24 = vpop.eup %3072  ;;  %v1463_v25 = vmul.f32 %v3071_v23, %v1435_v17  ;;  %v1453_v26 = vpop.xlane.xlu1 %1452 }
 0x445   :  { %v1462_v27 = vmul.f32 %v3073_v24, %v1432_v18  ;;  %3082 = vrcp.f32 %v1453_v26  ;;  %v1450_v28 = vpop.xlane.xlu0 %1449 }
 0x446   :  { %v1471_v29 = vsub.f32 2.0, %v1463_v25  ;;  %3084 = vrcp.f32 %v1450_v28 }
 0x447   :  { %v3075_v30 = vpop.eup %3074  ;;  %v1470_v31 = vsub.f32 2.0, %v1462_v27 }
 0x448   :  { %v3077_v32 = vpop.eup %3076  ;;  %v1479_v33 = vmul.f32 %v3071_v23, %v1471_v29  ;;  %v1465_v34 = vmul.f32 %v3075_v30, %v1441_v19 }
 0x449   :  { %v1478_v35 = vmul.f32 %v3073_v24, %v1470_v31  ;;  %v1464_v36 = vmul.f32 %v3077_v32, %v1438_v20 }
 0x44a   :  { %v1473_v37 = vsub.f32 2.0, %v1465_v34  ;;  %v1487_v42 = vmul.f32 %v3055_v59, %v1479_v33 }
 0x44b   :  { %v3079_v38 = vpop.eup %3078  ;;  %v1486_v39 = vmul.f32 %v3057_v62, %v1478_v35  ;;  %v1472_v40 = vsub.f32 2.0, %v1464_v36 }
 0x44c   :  { %v3081_v41 = vpop.eup %3080  ;;  %v1481_v43 = vmul.f32 %v3075_v30, %v1473_v37  ;;  %v1467_v45 = vmul.f32 %v3079_v38, %v1447_v21  ;;  %v2470_v37 = vld [vmem:[%s3616_s6 + $0x4] ss:$0 sm:$0xff] }
 0x44d   :  { %v1480_v46 = vmul.f32 %v3077_v32, %v1472_v40  ;;  %v1466_v47 = vmul.f32 %v3081_v41, %v1444_v22  ;;  %2781 = vmatprep.mubr.msk.f32.mxu0 %vm1381_vm3, %v1486_v39 }
 0x44e   :  { %v1475_v48 = vsub.f32 2.0, %v1467_v45  ;;  %2782 = vmatmul.mubr.msk.f32.vlgmr.msra.gmra.mrb[18].mxu0 %vm1381_vm3, %v1487_v42  ;;  %v1489_v52 = vmul.f32 %v3428_v4, %v1481_v43  ;;  %v1820_v4 = vld [vmem:[%s3613_s3 + $0x10] sm:$0xff] }
 0x44f   :  { %v3083_v44 = vpop.eup %3082  ;;  %v1488_v49 = vmul.f32 %v3061_v5, %v1480_v46  ;;  %v1474_v50 = vsub.f32 2.0, %v1466_v47  ;;  %2998 = vmatpush3.bf16.msra.mxu0 %v3395_v60  ;;  %v1821_v5 = vld [vmem:[%s3613_s3 + $0x18] sm:$0xff] }
 0x450   :  { %v3085_v51 = vpop.eup %3084  ;;  %v1483_v53 = vmul.f32 %v3079_v38, %v1475_v48  ;;  %v1469_v54 = vmul.f32 %v3083_v44, %v1453_v26  ;;  %3000 = vmatprep.subr.bf16.mxu0 %v3410_v10 }
 0x451   :  { %v1482_v55 = vmul.f32 %v3081_v41, %v1474_v50  ;;  %v1468_v56 = vmul.f32 %v3085_v51, %v1450_v28  ;;  %2788 = vmatprep.mubr.msk.f32.mxu0 %vm1381_vm3, %v1488_v49 }
 0x452   :  { %v1477_v57 = vsub.f32 2.0, %v1469_v54  ;;  %2789 = vmatmul.mubr.msk.f32.vlgmr.msra.gmra.mrb[20].mxu0 %vm1381_vm3, %v1489_v52  ;;  %v1491_v60 = vmul.f32 %v3433_v8, %v1483_v53  ;;  %v2206_v52 = vld [vmem:[%s3614_s4] sm:$0xff]  ;;  %v2207_v53 = vld [vmem:[%s3614_s4 + $0x8] sm:$0xff] }
 0x453   :  { %v1490_v58 = vmul.f32 %v3435_v9, %v1482_v55  ;;  %v1476_v59 = vsub.f32 2.0, %v1468_v56  ;;  %3002 = vmatpush3.bf16.msra.mxu0 %v3410_v10  ;;  %v1818_v10 = vld [vmem:[%s3613_s3] sm:$0xff]  ;;  %v3007_v54 = vpack.c.bf16 %v2207_v53, %v2206_v52  ;;  %v2208_v55 = vld [vmem:[%s3614_s4 + $0x10] sm:$0xff]  ;;  %v2209_v56 = vld [vmem:[%s3614_s4 + $0x18] sm:$0xff] }
 0x454   :  { %v1485_v61 = vmul.f32 %v3083_v44, %v1477_v57  ;;  %2805 = vmatprep.subr.mxu0 %v1818_v10  ;;  %v3011_v57 = vpack.c.bf16 %v2209_v56, %v2208_v55 }
 0x455   :  { %v1484_v62 = vmul.f32 %v3085_v51, %v1476_v59  ;;  %2795 = vmatprep.mubr.msk.f32.mxu0 %vm1381_vm3, %v1490_v58  ;;  %v2297_v58 = vld [vmem:[%s3615_s5] sm:$0xff]  ;;  %v2298_v59 = vld [vmem:[%s3615_s5 + $0x8] sm:$0xff] }
 0x456   :  { %2796 = vmatmul.mubr.msk.f32.vlgmr.msra.gmra.mrb[22].mxu0 %vm1381_vm3, %v1491_v60  ;;  %v1493_v2 = vmul.f32 %v3441_v13, %v1485_v61  ;;  %v2299_v60 = vld [vmem:[%s3615_s5 + $0x10] sm:$0xff]  ;;  %v3015_v61 = vpack.c.bf16 %v2298_v59, %v2297_v58 }
 0x457   :  { %v1492_v63 = vmul.f32 %v3443_v14, %v1484_v62  ;;  %2806 = vmatpush3.msra.mxu0 %v1818_v10  ;;  %v2300_v62 = vld [vmem:[%s3615_s5 + $0x18] sm:$0xff]  ;;  %v2302_v10 = vld [vmem:[%s3615_s5 + $0x28] sm:$0xff] }
 0x458   :  { %2815 = vmatprep.subr.mxu0 %v1820_v4 }
 0x459   :  { %2802 = vmatprep.mubr.msk.f32.mxu1 %vm1381_vm3, %v1492_v63  ;;  %v3019_v63 = vpack.c.bf16 %v2300_v62, %v2299_v60 }
 0x45a   :  { %2803 = vmatmul.mubr.msk.f32.vlgmr.msra.gmra.mrb[14].mxu1 %vm1381_vm3, %v1493_v2  ;;  %v2301_v2 = vld [vmem:[%s3615_s5 + $0x20] sm:$0xff] }
 0x45b   :  { %2811 = vmatpush3.msra.mxu1 %v1819_v3  ;;  %v3023_v3 = vpack.c.bf16 %v2302_v10, %v2301_v2 }
 0x45c   :  { %2820 = vmatprep.subr.mxu1 %v1821_v5 }
 0x521   :  { %v2783_v6 = vpop.f32.mrb[18].mxu0 }
 0x522   :  { %v1566_v7 = vpop.f32.mrb[19].mxu0 }
 0x523   :  { %2807 = vmatprep.mubr.msk.f32.mxu0 %vm1032_vm1, %v1566_v7  ;;  %v2305_v7 = vld [vmem:[%s3615_s5 + $0x40] sm:$0xff] }
 0x524   :  { %2808 = vmatmul.mubr.msk.f32.vlgmr.msra.gmra.mrb[24].mxu0 %vm1032_vm1, %v2783_v6 }
 0x525   :  { %v2790_v8 = vpop.f32.mrb[20].mxu0  ;;  %2816 = vmatpush3.msra.mxu0 %v1820_v4  ;;  %v2303_v4 = vld [vmem:[%s3615_s5 + $0x30] sm:$0xff] }
 0x526   :  { %v1647_v9 = vpop.f32.mrb[21].mxu0  ;;  %3008 = vmatprep.subr.bf16.mxu0 %v3007_v54 }
 0x527   :  { %2812 = vmatprep.mubr.msk.f32.mxu1 %vm1032_vm1, %v1647_v9 }
 0x528   :  { %2813 = vmatmul.mubr.msk.f32.vlgmr.msra.gmra.mrb[16].mxu1 %vm1032_vm1, %v2790_v8  ;;  %v2306_v8 = vld [vmem:[%s3615_s5 + $0x48] sm:$0xff] }
 0x529   :  { %v2797_v11 = vpop.f32.mrb[22].mxu0  ;;  %2821 = vmatpush3.msra.mxu1 %v1821_v5  ;;  %v2304_v5 = vld [vmem:[%s3615_s5 + $0x38] sm:$0xff]  ;;  %v3031_v9 = vpack.c.bf16 %v2306_v8, %v2305_v7 }
 0x52a   :  { %v1728_v12 = vpop.f32.mrb[23].mxu0  ;;  %3016 = vmatprep.subr.bf16.mxu1 %v3015_v61  ;;  %v3027_v6 = vpack.c.bf16 %v2304_v5, %v2303_v4 }
 0x52b   :  { %2817 = vmatprep.mubr.msk.f32.mxu0 %vm1032_vm1, %v1728_v12  ;;  %v2308_v12 = vld [vmem:[%s3615_s5 + $0x58] sm:$0xff] }
 0x52c   :  { %2818 = vmatmul.mubr.msk.f32.vlgmr.msra.gmra.mrb[26].mxu0 %vm1032_vm1, %v2797_v11  ;;  %v2307_v11 = vld [vmem:[%s3615_s5 + $0x50] sm:$0xff] }
 0x52d   :  { %v2804_v13 = vpop.f32.mrb[14].mxu1  ;;  %3010 = vmatpush3.bf16.msra.mxu0 %v3007_v54 }
 0x52e   :  { %v1809_v14 = vpop.f32.mrb[15].mxu1  ;;  %3012 = vmatprep.subr.bf16.mxu0 %v3011_v57 }
 0x52f   :  { %2822 = vmatprep.mubr.msk.f32.mxu1 %vm1032_vm1, %v1809_v14  ;;  %v2309_v14 = vld [vmem:[%s3615_s5 + $0x60] sm:$0xff] }
 0x530   :  { %2823 = vmatmul.mubr.msk.f32.vlgmr.msra.gmra.mrb[18].mxu1 %vm1032_vm1, %v2804_v13  ;;  %v3035_v13 = vpack.c.bf16 %v2308_v12, %v2307_v11 }
 0x531   :  { %3014 = vmatpush3.bf16.msra.mxu0 %v3011_v57  ;;  %3018 = vmatpush3.bf16.msra.mxu1 %v3015_v61 }
 0x532   :  { %3020 = vmatprep.subr.bf16.mxu1 %v3019_v63 }
 0x535   :  { %3022 = vmatpush3.bf16.msra.mxu1 %v3019_v63 }
 0x536   :  { %3024 = vmatprep.subr.bf16.mxu1 %v3023_v3 }
 0x539   :  { %3026 = vmatpush3.bf16.msra.mxu1 %v3023_v3 }
 0x53a   :  { %3028 = vmatprep.subr.bf16.mxu1 %v3027_v6 }
 0x53d   :  { %3030 = vmatpush3.bf16.msra.mxu1 %v3027_v6 }
 0x53e   :  { %3032 = vmatprep.subr.bf16.mxu1 %v3031_v9 }
 0x541   :  { %3034 = vmatpush3.bf16.msra.mxu1 %v3031_v9 }
 0x542   :  { %3036 = vmatprep.subr.bf16.mxu1 %v3035_v13 }
 0x545   :  { %3038 = vmatpush3.bf16.msra.mxu1 %v3035_v13 }
 0x5f7   :  { %v2809_v15 = vpop.f32.mrb[24].mxu0 }
 0x5f8   :  { %v1894_v16 = vpop.f32.mrb[25].mxu0  ;;  %v2153_v18 = vsel %vm36_vm0, %v2809_v15, 0.0  ;;  %v2310_v15 = vld [vmem:[%s3615_s5 + $0x68] sm:$0xff] }
 0x5f9   :  { %v2146_v21 = vsel %vm36_vm0, %v1894_v16, 0.0  ;;  %v3039_v16 = vpack.c.bf16 %v2310_v15, %v2309_v14 }
 0x5fb   :  { %v2814_v17 = vpop.f32.mrb[16].mxu1  ;;  %3040 = vmatprep.subr.bf16.mxu1 %v3039_v16 }
 0x5fc   :  { %v2154_v19 = vsel %vm36_vm0, %v2814_v17, 0.0  ;;  %v1975_v20 = vpop.f32.mrb[17].mxu1  ;;  %3042 = vmatpush3.bf16.msra.mxu1 %v3039_v16 }
 0x5fd   :  { %v2155_v22 = vadd.f32 %v2154_v19, %v2153_v18  ;;  %v2147_v23 = vsel %vm36_vm0, %v1975_v20, 0.0 }
 0x5fe   :  { %v2148_v24 = vadd.f32 %v2147_v23, %v2146_v21 }
 0x5ff   :  { %v2819_v25 = vpop.f32.mrb[26].mxu0 }
 0x600   :  { %v2156_v26 = vsel %vm36_vm0, %v2819_v25, 0.0  ;;  %v2056_v27 = vpop.f32.mrb[27].mxu0 }
 0x601   :  { %v2157_v28 = vadd.f32 %v2156_v26, %v2155_v22  ;;  %v2149_v29 = vsel %vm36_vm0, %v2056_v27, 0.0 }
 0x602   :  { %v2150_v30 = vadd.f32 %v2149_v29, %v2148_v24  ;;  %v2471_v24 = vld [vmem:[%s3616_s6 + $0x2] ss:$0 sm:$0xff] }
 0x603   :  { %v2824_v31 = vpop.f32.mrb[18].mxu1 }
 0x604   :  { %v2158_v32 = vsel %vm36_vm0, %v2824_v31, 0.0  ;;  %v2137_v33 = vpop.f32.mrb[19].mxu1 }
 0x605   :  { %v2159_v34 = vadd.f32 %v2158_v32, %v2157_v28  ;;  %v2151_v35 = vsel %vm36_vm0, %v2137_v33, 0.0  ;;  %v2472_v28 = vld [vmem:[%s3616_s6 + $0x3] ss:$0 sm:$0xff]  ;;  %v2311_v33 = vld [vmem:[%s3615_s5 + $0x70] sm:$0xff] }
 0x606   :  { %v2152_v36 = vadd.f32 %v2151_v35, %v2150_v30 }
 0x607   :  { %v2161_v38 = vadd.f32 %v2159_v34, %v3165_v1  ;;  %v2312_v34 = vld [vmem:[%s3615_s5 + $0x78] sm:$0xff]  ;;  %s3114_s5 = smov [#allocation2]  }
 0x608   :  { %v2160_v39 = vadd.f32 %v2152_v36, %v3160_v0  ;;  %v3043_v35 = vpack.c.bf16 %v2312_v34, %v2311_v33  ;;  %v2473_v36 = vld [vmem:[%s3616_s6 + $0x6] ss:$0 sm:$0xff]  ;;  %s2401_s12 = sshll.u32 %s3114_s5, 4  ;;  %s2402_s12 = int_to_ptr.vmem [resolvable:$true] %s2401_s12 }
 0x609   :  { %v3498_v40 = vadd.f32 %v2470_v37, %v2161_v38  ;;  %s3090_s13 = scalar_lea.vmem %s2402_s12, 256  ;;  %p3095_p1 = scmp.lt.s32.totalorder %s2402_s12, %s2402_s12 }
 0x60a   :  { %v3500_v41 = vadd.f32 %v2470_v37, %v2160_v39  ;;  %3044 = vmatprep.subr.bf16.mxu1 %v3043_v35  ;;  %p3091_p0 = scmp.ne.s32.totalorder %s2402_s12, %s3090_s13  ;;  %p3096_p2 = scmp.lt.s32.totalorder %s3090_s13, %s3090_s13 }
 0x60b   :  { %v2171_v42 = vsel %vm36_vm0, %v3498_v40, 0.0  ;;  %3046 = vmatpush3.bf16.msra.mxu1 %v3043_v35 }
 0x60c   :  { %2172 = vadd.xlane.f32.xlu1 %v2171_v42  ;;  %v2168_v43 = vsel %vm36_vm0, %v3500_v41, 0.0  ;;  %p3097_p3 = por %p3096_p2, %p3095_p1 }
 0x60d   :  { %2169 = vadd.xlane.f32.xlu0 %v2168_v43 }
 0x60e   :  { %p3098_p4 = pnand %p3097_p3, %p3091_p0 }
 0x699   :  { %v2173_v45 = vpop.xlane.xlu1 %2172 }
 0x69a   :  { %v2175_v46 = vmul.f32 0.03125, %v2173_v45  ;;  %v2170_v47 = vpop.xlane.xlu0 %2169 }
 0x69b   :  { %v2174_v48 = vmul.f32 0.03125, %v2170_v47 }
 0x69c   :  { %v3507_v1 = vsub.f32 %v3498_v40, %v2175_v46  ;;  %v2476_v46 = vld [vmem:[%s3616_s6 + $0x5] ss:$0 sm:$0xff] }
 0x69d   :  { %v3510_v0 = vsub.f32 %v3500_v41, %v2174_v48 }
 0x69e   :  { %v2179_v44 = vmul.f32 %v3507_v1, %v3507_v1 }
 0x69f   :  { %v2178_v49 = vmul.f32 %v3510_v0, %v3510_v0 }
 0x6a0   :  { %v2183_v50 = vsel %vm36_vm0, %v2179_v44, 0.0 }
 0x6a1   :  { %2184 = vadd.xlane.f32.xlu1 %v2183_v50  ;;  %v2180_v51 = vsel %vm36_vm0, %v2178_v49, 0.0 }
 0x6a2   :  { %2181 = vadd.xlane.f32.xlu0 %v2180_v51 }
 0x72e   :  { %v2185_v17 = vpop.xlane.xlu1 %2184 }
 0x72f   :  { %v2187_v18 = vmul.f32 0.03125, %v2185_v17  ;;  %v2182_v19 = vpop.xlane.xlu0 %2181 }
 0x730   :  { %v2186_v20 = vmul.f32 0.03125, %v2182_v19 }
 0x731   :  { %v2189_v21 = vadd.f32 1e-05, %v2187_v18 }
 0x732   :  { %v2188_v22 = vadd.f32 1e-05, %v2186_v20 }
 0x733   :  { %3086 = vrsqrt.f32 %v2189_v21 }
 0x734   :  { %3088 = vrsqrt.f32 %v2188_v22 }
 0x73d   :  { %v3087_v23 = vpop.eup %3086 }
 0x73e   :  { %v3089_v25 = vpop.eup %3088  ;;  %v2193_v26 = vmul.f32 %v3087_v23, %v3507_v1 }
 0x73f   :  { %v2192_v27 = vmul.f32 %v3089_v25, %v3510_v0 }
 0x740   :  { %v2199_v29 = vmul.f32 %v2471_v24, %v2193_v26 }
 0x741   :  { %v2198_v30 = vmul.f32 %v2471_v24, %v2192_v27 }
 0x742   :  { %v2205_v32 = vadd.f32 %v2472_v28, %v2199_v29 }
 0x743   :  { %v2204_v31 = vadd.f32 %v2472_v28, %v2198_v30 }
 0x745   :  { %2833 = vmatprep.mubr.msk.f32.mxu0 %vm36_vm0, %v2204_v31 }
 0x746   :  { %2834 = vmatmul.mubr.msk.f32.vlgmr.msra.gmra.mrb[28].mxu0 %vm36_vm0, %v2205_v32 }
 0x819   :  { %v2835_v37 = vpop.f32.mrb[28].mxu0 }
 0x81a   :  { %v2292_v38 = vadd.f32 %v2835_v37, %v2473_v36  ;;  %v2286_v39 = vpop.f32.mrb[29].mxu0 }
 0x81b   :  { %v2287_v42 = vadd.f32 %v2473_v36, %v2286_v39 }
 0x81c   :  { %v2296_v45 = vmax.f32 %v2292_v38, 0.0 }
 0x81d   :  { %v2295_v43 = vmax.f32 %v2287_v42, 0.0 }
 0x81f   :  { %2868 = vmatprep.mubr.f32.mxu1 %v2295_v43 }
 0x820   :  { %2869 = vmatmul.mubr.f32.vlgmr.msra.gmra.mrb[20].mxu1 %v2296_v45 }
 0x8f3   :  { %v2870_v47 = vpop.f32.mrb[20].mxu1 }
 0x8f4   :  { %v2389_v48 = vadd.f32 %v2870_v47, %v2476_v46  ;;  %v2383_v1 = vpop.f32.mrb[21].mxu1 }
 0x8f5   :  { %v2384_v0 = vadd.f32 %v2476_v46, %v2383_v1 }
 0x8f6   :  { %v2393_v44 = vadd.f32 %v2389_v48, %v3498_v40 }
 0x8f7   :  { %v2392_v49 = vadd.f32 %v2384_v0, %v3500_v41 }
 0x8f8   :  { %2395 = vst.msk [vmem:[#allocation2 + $0x8] sm:$0xff] %vm36_vm0, %v2393_v44 }
 0x8f9   :  { %2394 = vst.msk [vmem:[#allocation2] sm:$0xff] %vm36_vm0, %v2392_v49 }
 0x8fa   :  { %3101 = shalt.err (!%p3098_p4)
}
 0x8fb   :  { %s3102_s15 = scalar_lea.hbm %s3617_s7, 256 }
 0x8fc   :  { %p3103_p5 = scmp.ne.s32.totalorder %s3617_s7, %s3102_s15  ;;  %p3106_p6 = scmp.lt.u32.totalorder %s3102_s15, %s3617_s7 }
 0x8fe   :  { %p3108_p7 = pnand %p3106_p6, %p3103_p5 }
 0x900   :  { %3111 = shalt.err (!%p3108_p7)
}
 0x901   :  { %s3115_s19 = smov 128   ;;  %s3116_s20 = smov 8  }
 0x902   :  { %2407 = dma.vmem_to_hbm [thread:$0]  %s2402_s12, 256, %s3617_s7, [#allocation3], %s3115_s19, %s3115_s19, %s3116_s20  }
 0x903   :  { %3112 = dma.done.wait [#allocation3], 256  }
 0x904   :  { %3113 = vsyncadd [#allocation3], 4294967040 }
 0x905   :  { %2411 = vsyncpa [#allocation3], 1 }

</bundles_post_ra>
